<compile_context>
chip_gen: v5e
topology: v5e:2x2
jax: 0.10.0
libtpu: 0.0.40
codegen_flags: <defaults>
</compile_context>

<pallas_src>
import functools

import jax
import jax.numpy as jnp
import numpy as np
from jax.experimental import pallas as pl
from jax.experimental.pallas import tpu as pltpu

LANE = 128  # TPU vreg lane width


# ---------------------------------------------------------------------------
# Pallas kernel
# ---------------------------------------------------------------------------
def actor_kernel(params_ref, obs_ref, out_ref, *, obs_dim):
    """Fused 3-layer MLP actor.

    params_ref layout (rows, all 128 lanes wide, zero padded):
      [0, obs_dim)                      : W1  (obs_dim, h1)
      [obs_dim, obs_dim + 128)          : W2  (h1, h2)      in rows [0, h1)
      [obs_dim + 128, obs_dim + 256)    : W3  (h2, act_dim) in rows [0, h2)
      [obs_dim + 256, obs_dim + 264)    : row 0 = b1, row 1 = b2, row 2 = b3,
                                          row 3 = action_max (broadcast row)
    """
    obs = obs_ref[...]                                        # (TB, obs_dim)

    w1 = params_ref[0:obs_dim, :]                             # (obs_dim, 128)
    w2 = params_ref[obs_dim:obs_dim + LANE, :]                # (128, 128)
    w3 = params_ref[obs_dim + LANE:obs_dim + 2 * LANE, :]     # (128, 128)
    r = obs_dim + 2 * LANE
    b1 = params_ref[r + 0:r + 1, :]                           # (1, 128)
    b2 = params_ref[r + 1:r + 2, :]
    b3 = params_ref[r + 2:r + 3, :]
    amax = params_ref[r + 3:r + 4, :]

    h = jnp.maximum(jnp.dot(obs, w1, preferred_element_type=jnp.float32) + b1, 0.0)
    h = jnp.maximum(jnp.dot(h, w2, preferred_element_type=jnp.float32) + b2, 0.0)
    pre = jnp.dot(h, w3, preferred_element_type=jnp.float32) + b3
    act = jnp.tanh(pre) * amax

    # Lane-dense packed output: act in [0,128), pre_act in [128,256).
    out_ref[:, 0:LANE] = act
    out_ref[:, LANE:2 * LANE] = pre


# ---------------------------------------------------------------------------
# Wrapper
# ---------------------------------------------------------------------------
def _pick_batch_tile(batch):
    for tb in (256, 128, 64, 32, 16, 8):
        if batch % tb == 0:
            return tb
    return batch  # tiny / odd batch: single whole-batch block


@functools.partial(jax.jit, static_argnames=("obs_dim", "act_dim"))
def mlp_actor_forward(packed_params, obs, *, obs_dim, act_dim):
    """Returns (tanh(pre_act) * action_max, pre_act), matching MLPActor.forward."""
    batch = obs.shape[0]
    tb = _pick_batch_tile(batch)
    grid = (batch // tb,)
    p_rows = packed_params.shape[0]

    out = pl.pallas_call(
        functools.partial(actor_kernel, obs_dim=obs_dim),
        out_shape=jax.ShapeDtypeStruct((batch, 2 * LANE), jnp.float32),
        grid=grid,
        in_specs=[
            # Constant index map -> single DMA, stays VMEM-resident across steps.
            pl.BlockSpec((p_rows, LANE), lambda i: (0, 0)),
            # Batch-tiled obs, pipelined against compute.
            pl.BlockSpec((tb, obs_dim), lambda i: (i, 0)),
        ],
        out_specs=pl.BlockSpec((tb, 2 * LANE), lambda i: (i, 0)),
        compiler_params=pltpu.CompilerParams(
            dimension_semantics=("parallel",)),
    )(packed_params, obs)

    act = out[:, 0:act_dim]
    pre_act = out[:, LANE:LANE + act_dim]
    return act, pre_act


# ---------------------------------------------------------------------------
# Parameter packing
# ---------------------------------------------------------------------------
def pack_params(w1, b1, w2, b2, w3, b3, action_max):
    """Packs kernel-layout ([in, out]) weights into a single (P_ROWS, 128) buffer."""
    obs_dim, h1 = w1.shape
    _, h2 = w2.shape
    _, act_dim = w3.shape
    assert obs_dim % 8 == 0, "obs_dim must be a multiple of 8 for aligned slicing"
    assert h1 <= LANE and h2 <= LANE and act_dim <= LANE

    p_rows = obs_dim + 2 * LANE + 8
    p = jnp.zeros((p_rows, LANE), jnp.float32)
    p = p.at[0:obs_dim, 0:h1].set(w1)
    p = p.at[obs_dim:obs_dim + h1, 0:h2].set(w2)
    p = p.at[obs_dim + LANE:obs_dim + LANE + h2, 0:act_dim].set(w3)
    r = obs_dim + 2 * LANE
    p = p.at[r + 0, 0:h1].set(b1.reshape(-1))
    p = p.at[r + 1, 0:h2].set(b2.reshape(-1))
    p = p.at[r + 2, 0:act_dim].set(b3.reshape(-1))
    p = p.at[r + 3, 0:act_dim].set(jnp.full((act_dim,), action_max, jnp.float32))
    return p


# ---------------------------------------------------------------------------
# Deterministic parameter construction (mimics torch orthogonal_ init)
# ---------------------------------------------------------------------------
def orthogonal_weight(key, out_dim, in_dim, gain):
    """Returns an [in_dim, out_dim] weight (pre-transposed for x @ W)."""
    rows, cols = out_dim, in_dim
    a = jax.random.normal(key, (max(rows, cols), min(rows, cols)), dtype=jnp.float32)
    q, rmat = jnp.linalg.qr(a)
    q = q * jnp.sign(jnp.diag(rmat))
    if rows < cols:
        q = q.T
    w = gain * q[:rows, :cols]          # torch layout (out, in)
    return w.T.astype(jnp.float32)      # kernel layout (in, out)


def reference_forward(obs, w1, b1, w2, b2, w3, b3, action_max):
    """Pure-JAX reference matching MLPActor.forward semantics."""
    h = jnp.maximum(obs @ w1 + b1, 0.0)
    h = jnp.maximum(h @ w2 + b2, 0.0)
    pre = h @ w3 + b3
    return jnp.tanh(pre) * action_max, pre


# ---------------------------------------------------------------------------
if __name__ == "__main__":
    obs_dim, act_dim = 16, 4
    hidden = [32, 32]
    action_max = 2.0

    keys = jax.random.split(jax.random.PRNGKey(0), 8)
    # Weights: orthogonal, gain 1.0 for hidden layers, 0.01 for the output layer
    # (as in init_weights). Biases are zero-initialized by the module; we use
    # small nonzero values here purely to exercise the bias-add path.
    w1 = orthogonal_weight(keys[0], hidden[0], obs_dim, 1.0)
    w2 = orthogonal_weight(keys[1], hidden[1], hidden[0], 1.0)
    w3 = orthogonal_weight(keys[2], act_dim, hidden[1], 0.01)
    b1 = 0.1 * jax.random.normal(keys[3], (hidden[0],), jnp.float32)
    b2 = 0.1 * jax.random.normal(keys[4], (hidden[1],), jnp.float32)
    b3 = 0.1 * jax.random.normal(keys[5], (act_dim,), jnp.float32)

    packed = pack_params(w1, b1, w2, b2, w3, b3, action_max)

    for batch in (256, 8):  # grid of 2 tiles (TB=128), and a single tiny tile
        obs = jax.random.normal(keys[6], (batch, obs_dim), dtype=jnp.float32)

        act, pre_act = mlp_actor_forward(packed, obs, obs_dim=obs_dim, act_dim=act_dim)
        jax.block_until_ready((act, pre_act))

        act_ref, pre_ref = reference_forward(obs, w1, b1, w2, b2, w3, b3, action_max)
        assert act.shape == (batch, act_dim) and pre_act.shape == (batch, act_dim)
        np.testing.assert_allclose(np.asarray(act), np.asarray(act_ref),
                                   rtol=1e-5, atol=1e-5)
        np.testing.assert_allclose(np.asarray(pre_act), np.asarray(pre_ref),
                                   rtol=1e-5, atol=1e-5)

    print("KERNEL_OK")
</pallas_src>

<mosaic_0001>
module attributes {stable_mosaic.version = 11 : i64} {
  func.func @actor_kernel(%arg0: i32, %arg1: memref<280x128xf32, #tpu.memory_space<vmem>>, %arg2: memref<256x16xf32, #tpu.memory_space<vmem>>, %arg3: memref<256x256xf32, #tpu.memory_space<vmem>>) attributes {dimension_semantics = [#tpu.dimension_semantics<parallel>], iteration_bounds = array<i64: 1>, scalar_prefetch = 0 : i64, scratch_operands = 0 : i64, tpu.core_type = #tpu.core_type<tc>, window_params = [{pipeline_mode = #tpu.pipeline_mode<synchronous>, transform_indices = @transform_0, window_bounds = array<i64: 280, 128>}, {transform_indices = @transform_1, window_bounds = array<i64: 256, 16>}, {transform_indices = @transform_2, window_bounds = array<i64: 256, 256>}]} {
    %c0 = arith.constant 0 : index
    %c0_0 = arith.constant 0 : index
    %0 = vector.load %arg2[%c0, %c0_0] : memref<256x16xf32, #tpu.memory_space<vmem>>, vector<256x16xf32>
    %c0_1 = arith.constant 0 : index
    %c0_2 = arith.constant 0 : index
    %1 = vector.load %arg1[%c0_1, %c0_2] : memref<280x128xf32, #tpu.memory_space<vmem>>, vector<16x128xf32>
    %c16 = arith.constant 16 : index
    %c0_3 = arith.constant 0 : index
    %2 = vector.load %arg1[%c16, %c0_3] : memref<280x128xf32, #tpu.memory_space<vmem>>, vector<128x128xf32>
    %c144 = arith.constant 144 : index
    %c0_4 = arith.constant 0 : index
    %3 = vector.load %arg1[%c144, %c0_4] : memref<280x128xf32, #tpu.memory_space<vmem>>, vector<128x128xf32>
    %c272 = arith.constant 272 : index
    %c0_5 = arith.constant 0 : index
    %4 = vector.load %arg1[%c272, %c0_5] : memref<280x128xf32, #tpu.memory_space<vmem>>, vector<1x128xf32>
    %c273 = arith.constant 273 : index
    %c0_6 = arith.constant 0 : index
    %5 = vector.load %arg1[%c273, %c0_6] : memref<280x128xf32, #tpu.memory_space<vmem>>, vector<1x128xf32>
    %c274 = arith.constant 274 : index
    %c0_7 = arith.constant 0 : index
    %6 = vector.load %arg1[%c274, %c0_7] : memref<280x128xf32, #tpu.memory_space<vmem>>, vector<1x128xf32>
    %c275 = arith.constant 275 : index
    %c0_8 = arith.constant 0 : index
    %7 = vector.load %arg1[%c275, %c0_8] : memref<280x128xf32, #tpu.memory_space<vmem>>, vector<1x128xf32>
    %cst = arith.constant dense<0.000000e+00> : vector<256x128xf32>
    %8 = tpu.matmul %0, %1, %cst {dimension_numbers = #tpu.dot_dimension_numbers<[1], [0], [0], [1], [0, 0, 1, 1], [], []>} : vector<256x16xf32>, vector<16x128xf32>, vector<256x128xf32> -> vector<256x128xf32>
    %9 = vector.broadcast %4 : vector<1x128xf32> to vector<256x128xf32>
    %10 = arith.addf %8, %9 : vector<256x128xf32>
    %cst_9 = arith.constant 0.000000e+00 : f32
    %11 = vector.broadcast %cst_9 : f32 to vector<256x128xf32>
    %12 = arith.maximumf %10, %11 : vector<256x128xf32>
    %cst_10 = arith.constant dense<0.000000e+00> : vector<256x128xf32>
    %13 = tpu.matmul %12, %2, %cst_10 {dimension_numbers = #tpu.dot_dimension_numbers<[1], [0], [0], [1], [0, 0, 1, 1], [], []>} : vector<256x128xf32>, vector<128x128xf32>, vector<256x128xf32> -> vector<256x128xf32>
    %14 = vector.broadcast %5 : vector<1x128xf32> to vector<256x128xf32>
    %15 = arith.addf %13, %14 : vector<256x128xf32>
    %cst_11 = arith.constant 0.000000e+00 : f32
    %16 = vector.broadcast %cst_11 : f32 to vector<256x128xf32>
    %17 = arith.maximumf %15, %16 : vector<256x128xf32>
    %cst_12 = arith.constant dense<0.000000e+00> : vector<256x128xf32>
    %18 = tpu.matmul %17, %3, %cst_12 {dimension_numbers = #tpu.dot_dimension_numbers<[1], [0], [0], [1], [0, 0, 1, 1], [], []>} : vector<256x128xf32>, vector<128x128xf32>, vector<256x128xf32> -> vector<256x128xf32>
    %19 = vector.broadcast %6 : vector<1x128xf32> to vector<256x128xf32>
    %20 = arith.addf %18, %19 : vector<256x128xf32>
    %21 = math.tanh %20 : vector<256x128xf32>
    %22 = vector.broadcast %7 : vector<1x128xf32> to vector<256x128xf32>
    %23 = arith.mulf %21, %22 : vector<256x128xf32>
    %c0_13 = arith.constant 0 : index
    %c0_14 = arith.constant 0 : index
    %24 = vector.load %arg3[%c0_13, %c0_14] : memref<256x256xf32, #tpu.memory_space<vmem>>, vector<256x128xf32>
    tpu.vector_store %arg3[%c0_13, %c0_14], %23 {strides = array<i32>} : memref<256x256xf32, #tpu.memory_space<vmem>>, vector<256x128xf32>,
    %c0_15 = arith.constant 0 : index
    %c128 = arith.constant 128 : index
    %25 = vector.load %arg3[%c0_15, %c128] : memref<256x256xf32, #tpu.memory_space<vmem>>, vector<256x128xf32>
    tpu.vector_store %arg3[%c0_15, %c128], %20 {strides = array<i32>} : memref<256x256xf32, #tpu.memory_space<vmem>>, vector<256x128xf32>,
    return
  }
  func.func @transform_0(%arg0: i32) -> (i32, i32) {
    %c0_i32 = arith.constant 0 : i32
    %c0_i32_0 = arith.constant 0 : i32
    %c0_i32_1 = arith.constant 0 : i32
    return %c0_i32, %c0_i32_0 : i32, i32
  }
  func.func @transform_1(%arg0: i32) -> (i32, i32) {
    %c0_i32 = arith.constant 0 : i32
    %c0_i32_0 = arith.constant 0 : i32
    return %arg0, %c0_i32 : i32, i32
  }
  func.func @transform_2(%arg0: i32) -> (i32, i32) {
    %c0_i32 = arith.constant 0 : i32
    %c0_i32_0 = arith.constant 0 : i32
    return %arg0, %c0_i32 : i32, i32
  }
}

</mosaic_0001>

<bundles_post_ra>
// kernel: mlp_actor_forward.1
= control target key start
LH: loop header
LB: loop body
LE: loop exit
PB: predicated region body
PF: predicated region fallthrough
CT: control target
= control target key end

     0   :  { %vm82_vm0 = vcmask 130048   ;;  %s1436_s0 = inlined_call_operand.vmem [shape: f32[280,128], index: 0, kind: input, shape index: {}]   ;;  %s1437_s1 = inlined_call_operand.vmem [shape: f32[256,16], index: 1, kind: input, shape index: {}]   ;;  %s1438_s2 = inlined_call_operand.vmem [shape: f32[256,256], index: 2, kind: output, shape index: {}]  }
   0x1   :  { %v44_v0 = vld [vmem:[%s1436_s0 + $0x8] sm:$0xff]  ;;  %v43_v1 = vld [vmem:[%s1436_s0] sm:$0xff]  ;;  %v13_v4 = vld [vmem:[%s1437_s1 + $0x10] sm:$0xff] }
   0x2   :  { %193 = vmatpush.msra.mxu0 %v44_v0  ;;  %v11_v2 = vld [vmem:[%s1437_s1] sm:$0xff]  ;;  %749 = vmatpush.msra.mxu3 %v44_v0  ;;  %v12_v3 = vld [vmem:[%s1437_s1 + $0x8] sm:$0xff]  ;;  %v14_v5 = vld [vmem:[%s1437_s1 + $0x18] sm:$0xff] }
   0x3   :  { %v15_v6 = vld [vmem:[%s1437_s1 + $0x20] sm:$0xff]  ;;  %v16_v7 = vld [vmem:[%s1437_s1 + $0x28] sm:$0xff]  ;;  %v17_v8 = vld [vmem:[%s1437_s1 + $0x30] sm:$0xff] }
   0x4   :  { %194 = vmatpush.msra.mxu0 %v43_v1  ;;  %750 = vmatpush.msra.mxu3 %v43_v1  ;;  %v18_v9 = vld [vmem:[%s1437_s1 + $0x38] sm:$0xff]  ;;  %v19_v10 = vld [vmem:[%s1437_s1 + $0x40] sm:$0xff]  ;;  %v60_v11 = vld [vmem:[%s1436_s0 + $0x88] sm:$0xff] }
   0x5   :  { %717 = vmatmul.msk.f32.vlgmr.msra.gmra.mxu0 %vm82_vm0, %v11_v2  ;;  %v59_v12 = vld [vmem:[%s1436_s0 + $0x80] sm:$0xff]  ;;  %325 = vmatpush.msra.mxu1 %v60_v11  ;;  %v58_v13 = vld [vmem:[%s1436_s0 + $0x78] sm:$0xff]  ;;  %v20_v14 = vld [vmem:[%s1437_s1 + $0x48] sm:$0xff] }
   0x6   :  { %751 = vmatpush.msrb.mxu3 %v60_v11  ;;  %v57_v15 = vld [vmem:[%s1436_s0 + $0x70] sm:$0xff]  ;;  %v56_v16 = vld [vmem:[%s1436_s0 + $0x68] sm:$0xff]  ;;  %v55_v17 = vld [vmem:[%s1436_s0 + $0x60] sm:$0xff] }
   0x7   :  { %326 = vmatpush.msra.mxu1 %v59_v12  ;;  %v54_v18 = vld [vmem:[%s1436_s0 + $0x58] sm:$0xff]  ;;  %v21_v19 = vld [vmem:[%s1437_s1 + $0x50] sm:$0xff]  ;;  %v52_v21 = vld [vmem:[%s1436_s0 + $0x48] sm:$0xff] }
   0x8   :  { %752 = vmatpush.msrb.mxu3 %v59_v12  ;;  %v53_v20 = vld [vmem:[%s1436_s0 + $0x50] sm:$0xff]  ;;  %v51_v22 = vld [vmem:[%s1436_s0 + $0x40] sm:$0xff]  ;;  %v50_v23 = vld [vmem:[%s1436_s0 + $0x38] sm:$0xff] }
   0x9   :  { %327 = vmatpush.msra.mxu1 %v58_v13  ;;  %v22_v24 = vld [vmem:[%s1437_s1 + $0x58] sm:$0xff]  ;;  %v49_v25 = vld [vmem:[%s1436_s0 + $0x30] sm:$0xff]  ;;  %v48_v26 = vld [vmem:[%s1436_s0 + $0x28] sm:$0xff] }
   0xa   :  { %753 = vmatpush.msrb.mxu3 %v58_v13  ;;  %v47_v27 = vld [vmem:[%s1436_s0 + $0x20] sm:$0xff]  ;;  %v46_v29 = vld [vmem:[%s1436_s0 + $0x18] sm:$0xff]  ;;  %v45_v30 = vld [vmem:[%s1436_s0 + $0x10] sm:$0xff] }
   0xb   :  { %328 = vmatpush.msra.mxu1 %v57_v15  ;;  %v23_v28 = vld [vmem:[%s1437_s1 + $0x60] sm:$0xff]  ;;  %v24_v31 = vld [vmem:[%s1437_s1 + $0x68] sm:$0xff]  ;;  %v25_v32 = vld [vmem:[%s1437_s1 + $0x70] sm:$0xff] }
   0xc   :  { %754 = vmatpush.msrb.mxu3 %v57_v15  ;;  %v26_v33 = vld [vmem:[%s1437_s1 + $0x78] sm:$0xff]  ;;  %v987_v34 = vld [vmem:[%s1436_s0 + $0x110] ss:$0 sm:$0xff]  ;;  %v27_v36 = vld [vmem:[%s1437_s1 + $0x80] sm:$0xff] }
   0xd   :  { %718 = vmatmul.msk.f32.gmra.mxu0 %vm82_vm0, %v12_v3  ;;  %329 = vmatpush.msra.mxu1 %v56_v16  ;;  %v28_v40 = vld [vmem:[%s1437_s1 + $0x88] sm:$0xff]  ;;  %v29_v44 = vld [vmem:[%s1437_s1 + $0x90] sm:$0xff]  ;;  %v30_v48 = vld [vmem:[%s1437_s1 + $0x98] sm:$0xff] }
   0xe   :  { %755 = vmatpush.msrb.mxu3 %v56_v16  ;;  %v31_v52 = vld [vmem:[%s1437_s1 + $0xa0] sm:$0xff]  ;;  %v32_v56 = vld [vmem:[%s1437_s1 + $0xa8] sm:$0xff]  ;;  %v37_v59 = vld [vmem:[%s1437_s1 + $0xd0] sm:$0xff] }
   0xf   :  { %330 = vmatpush.msra.mxu1 %v55_v17  ;;  %743 = vmatmul.msk.f32.vlgmr.msra.gmra.mxu3 %vm82_vm0, %v37_v59  ;;  %v33_v61 = vld [vmem:[%s1437_s1 + $0xb0] sm:$0xff]  ;;  %v38_v0 = vld [vmem:[%s1437_s1 + $0xd8] sm:$0xff]  ;;  %v76_v11 = vld [vmem:[%s1436_s0 + $0x108] sm:$0xff] }
  0x10   :  { %756 = vmatpush.msrb.mxu3 %v55_v17  ;;  %v34_v2 = vld [vmem:[%s1437_s1 + $0xb8] sm:$0xff]  ;;  %v36_v13 = vld [vmem:[%s1437_s1 + $0xc8] sm:$0xff]  ;;  %471 = vmatpush.msra.mxu2 %v76_v11  ;;  %v75_v15 = vld [vmem:[%s1436_s0 + $0x100] sm:$0xff] }
  0x11   :  { %331 = vmatpush.msra.mxu1 %v54_v18  ;;  %v74_v17 = vld [vmem:[%s1436_s0 + $0xf8] sm:$0xff] }
  0x12   :  { %757 = vmatpush.msrb.mxu3 %v54_v18  ;;  %472 = vmatpush.msra.mxu2 %v75_v15  ;;  %v41_v18 = vld [vmem:[%s1437_s1 + $0xf0] sm:$0xff] }
  0x13   :  { %332 = vmatpush.msra.mxu1 %v53_v20 }
  0x14   :  { %758 = vmatpush.msrb.mxu3 %v53_v20  ;;  %473 = vmatpush.msra.mxu2 %v74_v17  ;;  %v72_v20 = vld [vmem:[%s1436_s0 + $0xe8] sm:$0xff] }
  0x15   :  { %719 = vmatmul.msk.f32.gmra.mxu0 %vm82_vm0, %v13_v4  ;;  %333 = vmatpush.msra.mxu1 %v52_v21 }
  0x16   :  { %759 = vmatpush.msrb.mxu3 %v52_v21 }
  0x17   :  { %334 = vmatpush.msra.mxu1 %v51_v22  ;;  %744 = vmatmul.msk.f32.gmra.mxu3 %vm82_vm0, %v38_v0 }
  0x18   :  { %760 = vmatpush.msrb.mxu3 %v51_v22 }
  0x19   :  { %335 = vmatpush.msra.mxu1 %v50_v23 }
  0x1a   :  { %761 = vmatpush.msrb.mxu3 %v50_v23  ;;  %v71_v23 = vld [vmem:[%s1436_s0 + $0xe0] sm:$0xff] }
  0x1b   :  { %336 = vmatpush.msra.mxu1 %v49_v25 }
  0x1c   :  { %762 = vmatpush.msrb.mxu3 %v49_v25  ;;  %v70_v25 = vld [vmem:[%s1436_s0 + $0xd8] sm:$0xff] }
  0x1d   :  { %720 = vmatmul.msk.f32.gmra.mxu0 %vm82_vm0, %v14_v5  ;;  %337 = vmatpush.msra.mxu1 %v48_v26  ;;  %v39_v5 = vld [vmem:[%s1437_s1 + $0xe0] sm:$0xff] }
  0x1e   :  { %763 = vmatpush.msrb.mxu3 %v48_v26  ;;  %v42_v26 = vld [vmem:[%s1437_s1 + $0xf8] sm:$0xff] }
  0x1f   :  { %338 = vmatpush.msra.mxu1 %v47_v27  ;;  %745 = vmatmul.msk.f32.gmra.mxu3 %vm82_vm0, %v39_v5 }
  0x20   :  { %764 = vmatpush.msrb.mxu3 %v47_v27  ;;  %v69_v27 = vld [vmem:[%s1436_s0 + $0xd0] sm:$0xff] }
  0x21   :  { %339 = vmatpush.msra.mxu1 %v46_v29 }
  0x22   :  { %765 = vmatpush.msrb.mxu3 %v46_v29 }
  0x23   :  { %340 = vmatpush.msra.mxu1 %v45_v30 }
  0x24   :  { %766 = vmatpush.msrb.mxu3 %v45_v30 }
  0x25   :  { %721 = vmatmul.msk.f32.gmra.mxu0 %vm82_vm0, %v15_v6 }
  0x26   :  { %767 = vmatpush.msra.mxu3 %v76_v11 }
  0x28   :  { %768 = vmatpush.msra.mxu3 %v75_v15 }
  0x2a   :  { %769 = vmatpush.msra.mxu3 %v74_v17 }
  0x2d   :  { %722 = vmatmul.msk.f32.gmra.mxu0 %vm82_vm0, %v16_v7  ;;  %v35_v7 = vld [vmem:[%s1437_s1 + $0xc0] sm:$0xff] }
  0x35   :  { %723 = vmatmul.msk.f32.gmra.mxu0 %vm82_vm0, %v17_v8 }
  0x3d   :  { %724 = vmatmul.msk.f32.gmra.mxu0 %vm82_vm0, %v18_v9 }
  0x45   :  { %725 = vmatmul.msk.f32.gmra.mxu0 %vm82_vm0, %v19_v10  ;;  %v40_v10 = vld [vmem:[%s1437_s1 + $0xe8] sm:$0xff] }
  0x46   :  { %746 = vmatmul.msk.f32.gmra.mxu3 %vm82_vm0, %v40_v10 }
  0x4d   :  { %726 = vmatmul.msk.f32.gmra.mxu0 %vm82_vm0, %v20_v14 }
  0x4e   :  { %747 = vmatmul.msk.f32.gmra.mxu3 %vm82_vm0, %v41_v18 }
  0x55   :  { %727 = vmatmul.msk.f32.gmra.mxu0 %vm82_vm0, %v21_v19  ;;  %v73_v19 = vld [vmem:[%s1436_s0 + $0xf0] sm:$0xff] }
  0x56   :  { %474 = vmatpush.msra.mxu2 %v73_v19  ;;  %770 = vmatpush.msra.mxu3 %v73_v19 }
  0x57   :  { %748 = vmatmul.msk.f32.gmra.mxu3 %vm82_vm0, %v42_v26 }
  0x58   :  { %475 = vmatpush.msra.mxu2 %v72_v20  ;;  %771 = vmatpush.msra.mxu3 %v72_v20 }
  0x5a   :  { %476 = vmatpush.msra.mxu2 %v71_v23  ;;  %772 = vmatpush.msra.mxu3 %v71_v23 }
  0x5c   :  { %477 = vmatpush.msra.mxu2 %v70_v25  ;;  %773 = vmatpush.msra.mxu3 %v70_v25 }
  0x5d   :  { %728 = vmatmul.msk.f32.gmra.mxu0 %vm82_vm0, %v22_v24 }
  0x5e   :  { %478 = vmatpush.msra.mxu2 %v69_v27  ;;  %774 = vmatpush.msra.mxu3 %v69_v27 }
  0x65   :  { %729 = vmatmul.msk.f32.gmra.mxu0 %vm82_vm0, %v23_v28  ;;  %v68_v28 = vld [vmem:[%s1436_s0 + $0xc8] sm:$0xff] }
  0x66   :  { %479 = vmatpush.msra.mxu2 %v68_v28  ;;  %775 = vmatpush.msra.mxu3 %v68_v28 }
  0x6d   :  { %730 = vmatmul.msk.f32.gmra.mxu0 %vm82_vm0, %v24_v31  ;;  %v67_v31 = vld [vmem:[%s1436_s0 + $0xc0] sm:$0xff] }
  0x6e   :  { %480 = vmatpush.msra.mxu2 %v67_v31  ;;  %776 = vmatpush.msra.mxu3 %v67_v31 }
  0x75   :  { %731 = vmatmul.msk.f32.gmra.mxu0 %vm82_vm0, %v25_v32 }
  0x7d   :  { %732 = vmatmul.msk.f32.gmra.mxu0 %vm82_vm0, %v26_v33  ;;  %v66_v33 = vld [vmem:[%s1436_s0 + $0xb8] sm:$0xff] }
  0x7e   :  { %481 = vmatpush.msra.mxu2 %v66_v33  ;;  %777 = vmatpush.msra.mxu3 %v66_v33 }
  0x82   :  { %v196_v35 = vpop.f32.mrf.mxu0 }
  0x83   :  { %v197_v37 = vadd.f32 %v987_v34, %v196_v35  ;;  %v65_v35 = vld [vmem:[%s1436_s0 + $0xb0] sm:$0xff] }
  0x84   :  { %482 = vmatpush.msra.mxu2 %v65_v35  ;;  %778 = vmatpush.msra.mxu3 %v65_v35 }
  0x85   :  { %733 = vmatmul.msk.f32.gmra.mxu0 %vm82_vm0, %v27_v36  ;;  %v292_v38 = vmax.f32 %v197_v37, 0.0  ;;  %v64_v36 = vld [vmem:[%s1436_s0 + $0xa8] sm:$0xff] }
  0x86   :  { %483 = vmatpush.msra.mxu2 %v64_v36  ;;  %779 = vmatpush.msra.mxu3 %v64_v36 }
  0x87   :  { %341 = vmatmul.f32.vlgmr.msra.gmra.mxu1 %v292_v38 }
  0x8a   :  { %v199_v39 = vpop.f32.mrf.mxu0 }
  0x8b   :  { %v200_v41 = vadd.f32 %v987_v34, %v199_v39  ;;  %v63_v39 = vld [vmem:[%s1436_s0 + $0xa0] sm:$0xff] }
  0x8c   :  { %484 = vmatpush.msra.mxu2 %v63_v39  ;;  %780 = vmatpush.msra.mxu3 %v63_v39 }
  0x8d   :  { %734 = vmatmul.msk.f32.gmra.mxu0 %vm82_vm0, %v28_v40  ;;  %v293_v42 = vmax.f32 %v200_v41, 0.0  ;;  %v62_v41 = vld [vmem:[%s1436_s0 + $0x98] sm:$0xff] }
  0x8e   :  { %485 = vmatpush.msra.mxu2 %v62_v41  ;;  %781 = vmatpush.msra.mxu3 %v62_v41 }
  0x8f   :  { %344 = vmatmul.f32.gmra.mxu1 %v293_v42  ;;  %v61_v42 = vld [vmem:[%s1436_s0 + $0x90] sm:$0xff] }
  0x90   :  { %486 = vmatpush.msra.mxu2 %v61_v42  ;;  %782 = vmatpush.msra.mxu3 %v61_v42 }
  0x92   :  { %v202_v43 = vpop.f32.mrf.mxu0  ;;  %v274_v39 = vpop.f32.mrf.mxu3 }
  0x93   :  { %v203_v45 = vadd.f32 %v987_v34, %v202_v43 }
  0x95   :  { %v294_v46 = vmax.f32 %v203_v45, 0.0  ;;  %735 = vmatmul.msk.f32.gmra.mxu0 %vm82_vm0, %v29_v44 }
  0x97   :  { %347 = vmatmul.f32.gmra.mxu1 %v294_v46 }
  0x9a   :  { %v205_v47 = vpop.f32.mrf.mxu0 }
  0x9b   :  { %v206_v49 = vadd.f32 %v987_v34, %v205_v47 }
  0x9d   :  { %v295_v50 = vmax.f32 %v206_v49, 0.0  ;;  %736 = vmatmul.msk.f32.gmra.mxu0 %vm82_vm0, %v30_v48 }
  0x9f   :  { %350 = vmatmul.f32.gmra.mxu1 %v295_v50 }
  0xa2   :  { %v208_v51 = vpop.f32.mrf.mxu0 }
  0xa3   :  { %v209_v53 = vadd.f32 %v987_v34, %v208_v51 }
  0xa5   :  { %v296_v54 = vmax.f32 %v209_v53, 0.0  ;;  %737 = vmatmul.msk.f32.gmra.mxu0 %vm82_vm0, %v31_v52  ;;  %v1120_v52 = vld [vmem:[%s1436_s0 + $0x111] ss:$0 sm:$0xff] }
  0xa7   :  { %353 = vmatmul.f32.gmra.mxu1 %v296_v54 }
  0xaa   :  { %v211_v55 = vpop.f32.mrf.mxu0 }
  0xab   :  { %v212_v57 = vadd.f32 %v987_v34, %v211_v55 }
  0xad   :  { %v297_v58 = vmax.f32 %v212_v57, 0.0  ;;  %738 = vmatmul.msk.f32.gmra.mxu0 %vm82_vm0, %v32_v56 }
  0xaf   :  { %356 = vmatmul.f32.gmra.mxu1 %v297_v58 }
  0xb2   :  { %v214_v60 = vpop.f32.mrf.mxu0 }
  0xb3   :  { %v215_v62 = vadd.f32 %v987_v34, %v214_v60 }
  0xb5   :  { %v298_v63 = vmax.f32 %v215_v62, 0.0  ;;  %739 = vmatmul.msk.f32.gmra.mxu0 %vm82_vm0, %v33_v61 }
  0xb7   :  { %359 = vmatmul.f32.gmra.mxu1 %v298_v63 }
  0xba   :  { %v217_v1 = vpop.f32.mrf.mxu0 }
  0xbb   :  { %v218_v3 = vadd.f32 %v987_v34, %v217_v1 }
  0xbd   :  { %v299_v4 = vmax.f32 %v218_v3, 0.0  ;;  %740 = vmatmul.msk.f32.gmra.mxu0 %vm82_vm0, %v34_v2 }
  0xbf   :  { %362 = vmatmul.f32.gmra.mxu1 %v299_v4 }
  0xc2   :  { %v220_v6 = vpop.f32.mrf.mxu0 }
  0xc3   :  { %v221_v8 = vadd.f32 %v987_v34, %v220_v6 }
  0xc5   :  { %v300_v9 = vmax.f32 %v221_v8, 0.0  ;;  %741 = vmatmul.msk.f32.gmra.mxu0 %vm82_vm0, %v35_v7 }
  0xc7   :  { %365 = vmatmul.f32.gmra.mxu1 %v300_v9 }
  0xca   :  { %v223_v12 = vpop.f32.mrf.mxu0 }
  0xcb   :  { %v224_v14 = vadd.f32 %v987_v34, %v223_v12 }
  0xcd   :  { %v301_v16 = vmax.f32 %v224_v14, 0.0  ;;  %742 = vmatmul.msk.f32.gmra.mxu0 %vm82_vm0, %v36_v13 }
  0xcf   :  { %368 = vmatmul.f32.gmra.mxu1 %v301_v16 }
  0xd2   :  { %v226_v21 = vpop.f32.mrf.mxu0 }
  0xd3   :  { %v227_v22 = vadd.f32 %v987_v34, %v226_v21 }
  0xd5   :  { %v302_v24 = vmax.f32 %v227_v22, 0.0 }
  0xd7   :  { %371 = vmatmul.f32.gmra.mxu1 %v302_v24 }
  0xda   :  { %v229_v29 = vpop.f32.mrf.mxu0 }
  0xdb   :  { %v230_v30 = vadd.f32 %v987_v34, %v229_v29 }
  0xdd   :  { %v303_v32 = vmax.f32 %v230_v30, 0.0 }
  0xdf   :  { %374 = vmatmul.f32.gmra.mxu1 %v303_v32 }
  0xe2   :  { %v232_v37 = vpop.f32.mrf.mxu0 }
  0xe3   :  { %v233_v38 = vadd.f32 %v987_v34, %v232_v37 }
  0xe5   :  { %v304_v40 = vmax.f32 %v233_v38, 0.0 }
  0xe7   :  { %377 = vmatmul.f32.gmra.mxu1 %v304_v40 }
  0xea   :  { %v235_v43 = vpop.f32.mrf.mxu0 }
  0xeb   :  { %v236_v44 = vadd.f32 %v987_v34, %v235_v43 }
  0xed   :  { %v305_v45 = vmax.f32 %v236_v44, 0.0 }
  0xef   :  { %380 = vmatmul.f32.gmra.mxu1 %v305_v45 }
  0xf2   :  { %v238_v46 = vpop.f32.mrf.mxu0 }
  0xf3   :  { %v239_v47 = vadd.f32 %v987_v34, %v238_v46 }
  0xf5   :  { %v306_v48 = vmax.f32 %v239_v47, 0.0 }
  0xf7   :  { %383 = vmatmul.f32.gmra.mxu1 %v306_v48  ;;  %v277_v48 = vpop.f32.mrf.mxu3 }
  0xfa   :  { %v241_v49 = vpop.f32.mrf.mxu0 }
  0xfb   :  { %v242_v50 = vadd.f32 %v987_v34, %v241_v49 }
  0xfd   :  { %v307_v51 = vmax.f32 %v242_v50, 0.0 }
  0xff   :  { %386 = vmatmul.f32.gmra.mxu1 %v307_v51 }
 0x102   :  { %v244_v53 = vpop.f32.mrf.mxu0 }
 0x103   :  { %v245_v54 = vadd.f32 %v987_v34, %v244_v53  ;;  %v275_v53 = vadd.f32 %v987_v34, %v274_v39 }
 0x104   :  { %v342_v55 = vpop.f32.mrf.mxu1 }
 0x105   :  { %v308_v56 = vmax.f32 %v245_v54, 0.0  ;;  %v343_v57 = vadd.f32 %v1120_v52, %v342_v55  ;;  %v318_v54 = vmax.f32 %v275_v53, 0.0 }
 0x107   :  { %v438_v58 = vmax.f32 %v343_v57, 0.0  ;;  %389 = vmatmul.f32.gmra.mxu1 %v308_v56  ;;  %v280_v57 = vpop.f32.mrf.mxu3 }
 0x109   :  { %487 = vmatmul.f32.vlgmr.msra.gmra.mxu2 %v438_v58 }
 0x10a   :  { %v247_v59 = vpop.f32.mrf.mxu0 }
 0x10b   :  { %v248_v60 = vadd.f32 %v987_v34, %v247_v59  ;;  %v278_v59 = vadd.f32 %v987_v34, %v277_v48 }
 0x10c   :  { %v345_v61 = vpop.f32.mrf.mxu1 }
 0x10d   :  { %v309_v62 = vmax.f32 %v248_v60, 0.0  ;;  %v346_v63 = vadd.f32 %v1120_v52, %v345_v61  ;;  %v319_v60 = vmax.f32 %v278_v59, 0.0 }
 0x10f   :  { %v439_v0 = vmax.f32 %v346_v63, 0.0  ;;  %392 = vmatmul.f32.gmra.mxu1 %v309_v62 }
 0x111   :  { %490 = vmatmul.f32.gmra.mxu2 %v439_v0  ;;  %v281_v0 = vadd.f32 %v987_v34, %v280_v57 }
 0x112   :  { %v250_v1 = vpop.f32.mrf.mxu0 }
 0x113   :  { %v251_v2 = vadd.f32 %v987_v34, %v250_v1  ;;  %v283_v1 = vpop.f32.mrf.mxu3 }
 0x114   :  { %v348_v3 = vpop.f32.mrf.mxu1 }
 0x115   :  { %v310_v4 = vmax.f32 %v251_v2, 0.0  ;;  %v349_v5 = vadd.f32 %v1120_v52, %v348_v3  ;;  %v320_v2 = vmax.f32 %v281_v0, 0.0 }
 0x117   :  { %v440_v6 = vmax.f32 %v349_v5, 0.0  ;;  %395 = vmatmul.f32.gmra.mxu1 %v310_v4 }
 0x119   :  { %493 = vmatmul.f32.gmra.mxu2 %v440_v6  ;;  %v284_v6 = vadd.f32 %v987_v34, %v283_v1 }
 0x11a   :  { %v253_v7 = vpop.f32.mrf.mxu0 }
 0x11b   :  { %v254_v8 = vadd.f32 %v987_v34, %v253_v7  ;;  %v286_v7 = vpop.f32.mrf.mxu3 }
 0x11c   :  { %v351_v9 = vpop.f32.mrf.mxu1 }
 0x11d   :  { %v311_v10 = vmax.f32 %v254_v8, 0.0  ;;  %v352_v11 = vadd.f32 %v1120_v52, %v351_v9  ;;  %v321_v8 = vmax.f32 %v284_v6, 0.0 }
 0x11f   :  { %v441_v12 = vmax.f32 %v352_v11, 0.0  ;;  %398 = vmatmul.f32.gmra.mxu1 %v311_v10 }
 0x121   :  { %496 = vmatmul.f32.gmra.mxu2 %v441_v12  ;;  %v287_v12 = vadd.f32 %v987_v34, %v286_v7 }
 0x122   :  { %v256_v13 = vpop.f32.mrf.mxu0 }
 0x123   :  { %v257_v14 = vadd.f32 %v987_v34, %v256_v13  ;;  %v322_v13 = vmax.f32 %v287_v12, 0.0 }
 0x124   :  { %v354_v15 = vpop.f32.mrf.mxu1 }
 0x125   :  { %v312_v16 = vmax.f32 %v257_v14, 0.0  ;;  %v355_v17 = vadd.f32 %v1120_v52, %v354_v15  ;;  %v289_v15 = vpop.f32.mrf.mxu3 }
 0x127   :  { %v442_v18 = vmax.f32 %v355_v17, 0.0  ;;  %401 = vmatmul.f32.gmra.mxu1 %v312_v16 }
 0x129   :  { %499 = vmatmul.f32.gmra.mxu2 %v442_v18  ;;  %v290_v18 = vadd.f32 %v987_v34, %v289_v15 }
 0x12a   :  { %v259_v19 = vpop.f32.mrf.mxu0 }
 0x12b   :  { %v260_v20 = vadd.f32 %v987_v34, %v259_v19  ;;  %v323_v19 = vmax.f32 %v290_v18, 0.0 }
 0x12c   :  { %v357_v21 = vpop.f32.mrf.mxu1 }
 0x12d   :  { %v313_v22 = vmax.f32 %v260_v20, 0.0  ;;  %v358_v23 = vadd.f32 %v1120_v52, %v357_v21 }
 0x12f   :  { %v443_v24 = vmax.f32 %v358_v23, 0.0  ;;  %404 = vmatmul.f32.gmra.mxu1 %v313_v22 }
 0x131   :  { %502 = vmatmul.f32.gmra.mxu2 %v443_v24 }
 0x132   :  { %v262_v25 = vpop.f32.mrf.mxu0 }
 0x133   :  { %v263_v26 = vadd.f32 %v987_v34, %v262_v25 }
 0x134   :  { %v360_v27 = vpop.f32.mrf.mxu1 }
 0x135   :  { %v314_v28 = vmax.f32 %v263_v26, 0.0  ;;  %v361_v29 = vadd.f32 %v1120_v52, %v360_v27  ;;  %v1158_v26 = vld [vmem:[%s1436_s0 + $0x112] ss:$0 sm:$0xff] }
 0x137   :  { %v444_v30 = vmax.f32 %v361_v29, 0.0  ;;  %407 = vmatmul.f32.gmra.mxu1 %v314_v28 }
 0x139   :  { %505 = vmatmul.f32.gmra.mxu2 %v444_v30 }
 0x13a   :  { %v265_v31 = vpop.f32.mrf.mxu0 }
 0x13b   :  { %v266_v32 = vadd.f32 %v987_v34, %v265_v31  ;;  %v1168_v31 = vld [vmem:[%s1436_s0 + $0x113] ss:$0 sm:$0xff] }
 0x13c   :  { %v363_v33 = vpop.f32.mrf.mxu1 }
 0x13d   :  { %v315_v35 = vmax.f32 %v266_v32, 0.0  ;;  %v364_v36 = vadd.f32 %v1120_v52, %v363_v33 }
 0x13f   :  { %v445_v37 = vmax.f32 %v364_v36, 0.0  ;;  %410 = vmatmul.f32.gmra.mxu1 %v315_v35 }
 0x141   :  { %508 = vmatmul.f32.gmra.mxu2 %v445_v37 }
 0x142   :  { %v268_v38 = vpop.f32.mrf.mxu0 }
 0x143   :  { %v269_v40 = vadd.f32 %v987_v34, %v268_v38 }
 0x144   :  { %v366_v41 = vpop.f32.mrf.mxu1 }
 0x145   :  { %v316_v42 = vmax.f32 %v269_v40, 0.0  ;;  %v367_v43 = vadd.f32 %v1120_v52, %v366_v41 }
 0x147   :  { %v446_v44 = vmax.f32 %v367_v43, 0.0  ;;  %413 = vmatmul.f32.vlgmr.msrb.gmra.mxu3 %v316_v42 }
 0x149   :  { %511 = vmatmul.f32.gmra.mxu2 %v446_v44 }
 0x14a   :  { %v271_v45 = vpop.f32.mrf.mxu0 }
 0x14b   :  { %v272_v46 = vadd.f32 %v987_v34, %v271_v45 }
 0x14c   :  { %v369_v47 = vpop.f32.mrf.mxu1 }
 0x14d   :  { %v317_v49 = vmax.f32 %v272_v46, 0.0  ;;  %v370_v50 = vadd.f32 %v1120_v52, %v369_v47 }
 0x14f   :  { %v447_v51 = vmax.f32 %v370_v50, 0.0  ;;  %416 = vmatmul.f32.gmra.mxu3 %v317_v49 }
 0x151   :  { %514 = vmatmul.f32.gmra.mxu2 %v447_v51 }
 0x154   :  { %v372_v55 = vpop.f32.mrf.mxu1 }
 0x155   :  { %v373_v56 = vadd.f32 %v1120_v52, %v372_v55 }
 0x157   :  { %v448_v58 = vmax.f32 %v373_v56, 0.0  ;;  %419 = vmatmul.f32.gmra.mxu3 %v318_v54 }
 0x159   :  { %517 = vmatmul.f32.gmra.mxu2 %v448_v58 }
 0x15c   :  { %v375_v61 = vpop.f32.mrf.mxu1 }
 0x15d   :  { %v376_v62 = vadd.f32 %v1120_v52, %v375_v61 }
 0x15f   :  { %v449_v63 = vmax.f32 %v376_v62, 0.0  ;;  %422 = vmatmul.f32.gmra.mxu3 %v319_v60 }
 0x161   :  { %520 = vmatmul.f32.gmra.mxu2 %v449_v63 }
 0x164   :  { %v378_v3 = vpop.f32.mrf.mxu1 }
 0x165   :  { %v379_v4 = vadd.f32 %v1120_v52, %v378_v3 }
 0x167   :  { %v450_v5 = vmax.f32 %v379_v4, 0.0  ;;  %425 = vmatmul.f32.gmra.mxu3 %v320_v2 }
 0x169   :  { %523 = vmatmul.f32.gmra.mxu2 %v450_v5 }
 0x16c   :  { %v381_v9 = vpop.f32.mrf.mxu1 }
 0x16d   :  { %v382_v10 = vadd.f32 %v1120_v52, %v381_v9 }
 0x16f   :  { %v451_v11 = vmax.f32 %v382_v10, 0.0  ;;  %428 = vmatmul.f32.gmra.mxu3 %v321_v8 }
 0x171   :  { %526 = vmatmul.f32.gmra.mxu2 %v451_v11 }
 0x174   :  { %v384_v14 = vpop.f32.mrf.mxu1 }
 0x175   :  { %v385_v16 = vadd.f32 %v1120_v52, %v384_v14 }
 0x177   :  { %v452_v17 = vmax.f32 %v385_v16, 0.0  ;;  %431 = vmatmul.f32.gmra.mxu3 %v322_v13 }
 0x179   :  { %529 = vmatmul.f32.gmra.mxu2 %v452_v17 }
 0x17c   :  { %v387_v20 = vpop.f32.mrf.mxu1 }
 0x17d   :  { %v388_v21 = vadd.f32 %v1120_v52, %v387_v20 }
 0x17f   :  { %v453_v22 = vmax.f32 %v388_v21, 0.0  ;;  %434 = vmatmul.f32.gmra.mxu3 %v323_v19 }
 0x181   :  { %532 = vmatmul.f32.gmra.mxu2 %v453_v22 }
 0x184   :  { %v390_v23 = vpop.f32.mrf.mxu1 }
 0x185   :  { %v391_v24 = vadd.f32 %v1120_v52, %v390_v23 }
 0x187   :  { %v454_v25 = vmax.f32 %v391_v24, 0.0 }
 0x189   :  { %535 = vmatmul.f32.gmra.mxu2 %v454_v25 }
 0x18c   :  { %v393_v27 = vpop.f32.mrf.mxu1  ;;  %v488_v34 = vpop.f32.mrf.mxu2 }
 0x18d   :  { %v394_v28 = vadd.f32 %v1120_v52, %v393_v27  ;;  %v489_v29 = vadd.f32 %v1158_v26, %v488_v34 }
 0x18f   :  { %v455_v30 = vmax.f32 %v394_v28, 0.0  ;;  %787 = vtanh.f32 %v489_v29  ;;  %681 = vst [vmem:[%s1438_s2 + $0x8] sm:$0xff] %v489_v29 }
 0x191   :  { %538 = vmatmul.f32.gmra.mxu2 %v455_v30 }
 0x194   :  { %v396_v32 = vpop.f32.mrf.mxu1  ;;  %v491_v33 = vpop.f32.mrf.mxu2 }
 0x195   :  { %v788_v35 = vpop.eup %787  ;;  %v397_v36 = vadd.f32 %v1120_v52, %v396_v32  ;;  %v492_v37 = vadd.f32 %v1158_v26, %v491_v33 }
 0x196   :  { %v617_v38 = vmul.f32 %v788_v35, %v1168_v31 }
 0x197   :  { %v456_v39 = vmax.f32 %v397_v36, 0.0  ;;  %789 = vtanh.f32 %v492_v37  ;;  %682 = vst [vmem:[%s1438_s2 + $0x18] sm:$0xff] %v492_v37 }
 0x198   :  { %649 = vst [vmem:[%s1438_s2] sm:$0xff] %v617_v38 }
 0x199   :  { %541 = vmatmul.f32.gmra.mxu2 %v456_v39 }
 0x19c   :  { %v399_v40 = vpop.f32.mrf.mxu1  ;;  %v494_v41 = vpop.f32.mrf.mxu2 }
 0x19d   :  { %v790_v42 = vpop.eup %789  ;;  %v400_v43 = vadd.f32 %v1120_v52, %v399_v40  ;;  %v495_v44 = vadd.f32 %v1158_v26, %v494_v41 }
 0x19e   :  { %v618_v45 = vmul.f32 %v790_v42, %v1168_v31 }
 0x19f   :  { %v457_v46 = vmax.f32 %v400_v43, 0.0  ;;  %791 = vtanh.f32 %v495_v44  ;;  %683 = vst [vmem:[%s1438_s2 + $0x28] sm:$0xff] %v495_v44 }
 0x1a0   :  { %650 = vst [vmem:[%s1438_s2 + $0x10] sm:$0xff] %v618_v45 }
 0x1a1   :  { %544 = vmatmul.f32.gmra.mxu2 %v457_v46 }
 0x1a4   :  { %v402_v47 = vpop.f32.mrf.mxu1  ;;  %v497_v48 = vpop.f32.mrf.mxu2 }
 0x1a5   :  { %v792_v49 = vpop.eup %791  ;;  %v403_v50 = vadd.f32 %v1120_v52, %v402_v47  ;;  %v498_v51 = vadd.f32 %v1158_v26, %v497_v48 }
 0x1a6   :  { %v619_v53 = vmul.f32 %v792_v49, %v1168_v31 }
 0x1a7   :  { %v458_v54 = vmax.f32 %v403_v50, 0.0  ;;  %793 = vtanh.f32 %v498_v51  ;;  %684 = vst [vmem:[%s1438_s2 + $0x38] sm:$0xff] %v498_v51 }
 0x1a8   :  { %651 = vst [vmem:[%s1438_s2 + $0x20] sm:$0xff] %v619_v53 }
 0x1a9   :  { %547 = vmatmul.f32.gmra.mxu2 %v458_v54 }
 0x1ac   :  { %v405_v55 = vpop.f32.mrf.mxu1  ;;  %v500_v56 = vpop.f32.mrf.mxu2 }
 0x1ad   :  { %v794_v57 = vpop.eup %793  ;;  %v406_v58 = vadd.f32 %v1120_v52, %v405_v55  ;;  %v501_v59 = vadd.f32 %v1158_v26, %v500_v56 }
 0x1ae   :  { %v620_v60 = vmul.f32 %v794_v57, %v1168_v31 }
 0x1af   :  { %v459_v61 = vmax.f32 %v406_v58, 0.0  ;;  %795 = vtanh.f32 %v501_v59  ;;  %685 = vst [vmem:[%s1438_s2 + $0x48] sm:$0xff] %v501_v59 }
 0x1b0   :  { %652 = vst [vmem:[%s1438_s2 + $0x30] sm:$0xff] %v620_v60 }
 0x1b1   :  { %550 = vmatmul.f32.gmra.mxu2 %v459_v61 }
 0x1b4   :  { %v408_v62 = vpop.f32.mrf.mxu1  ;;  %v503_v63 = vpop.f32.mrf.mxu2 }
 0x1b5   :  { %v796_v0 = vpop.eup %795  ;;  %v409_v1 = vadd.f32 %v1120_v52, %v408_v62  ;;  %v504_v2 = vadd.f32 %v1158_v26, %v503_v63 }
 0x1b6   :  { %v621_v3 = vmul.f32 %v796_v0, %v1168_v31 }
 0x1b7   :  { %v460_v4 = vmax.f32 %v409_v1, 0.0  ;;  %797 = vtanh.f32 %v504_v2  ;;  %686 = vst [vmem:[%s1438_s2 + $0x58] sm:$0xff] %v504_v2 }
 0x1b8   :  { %653 = vst [vmem:[%s1438_s2 + $0x40] sm:$0xff] %v621_v3 }
 0x1b9   :  { %553 = vmatmul.f32.gmra.mxu2 %v460_v4 }
 0x1bc   :  { %v411_v5 = vpop.f32.mrf.mxu1  ;;  %v506_v6 = vpop.f32.mrf.mxu2 }
 0x1bd   :  { %v798_v7 = vpop.eup %797  ;;  %v412_v8 = vadd.f32 %v1120_v52, %v411_v5  ;;  %v507_v9 = vadd.f32 %v1158_v26, %v506_v6 }
 0x1be   :  { %v622_v10 = vmul.f32 %v798_v7, %v1168_v31 }
 0x1bf   :  { %v461_v11 = vmax.f32 %v412_v8, 0.0  ;;  %799 = vtanh.f32 %v507_v9  ;;  %687 = vst [vmem:[%s1438_s2 + $0x68] sm:$0xff] %v507_v9 }
 0x1c0   :  { %654 = vst [vmem:[%s1438_s2 + $0x50] sm:$0xff] %v622_v10 }
 0x1c1   :  { %556 = vmatmul.f32.gmra.mxu2 %v461_v11 }
 0x1c4   :  { %v509_v12 = vpop.f32.mrf.mxu2 }
 0x1c5   :  { %v800_v13 = vpop.eup %799  ;;  %v510_v14 = vadd.f32 %v1158_v26, %v509_v12 }
 0x1c6   :  { %v623_v15 = vmul.f32 %v800_v13, %v1168_v31 }
 0x1c7   :  { %801 = vtanh.f32 %v510_v14  ;;  %688 = vst [vmem:[%s1438_s2 + $0x78] sm:$0xff] %v510_v14 }
 0x1c8   :  { %655 = vst [vmem:[%s1438_s2 + $0x60] sm:$0xff] %v623_v15 }
 0x1ca   :  { %v414_v16 = vpop.f32.mrf.mxu3 }
 0x1cb   :  { %v415_v17 = vadd.f32 %v1120_v52, %v414_v16 }
 0x1cc   :  { %v512_v18 = vpop.f32.mrf.mxu2 }
 0x1cd   :  { %v802_v19 = vpop.eup %801  ;;  %v462_v20 = vmax.f32 %v415_v17, 0.0  ;;  %v513_v21 = vadd.f32 %v1158_v26, %v512_v18 }
 0x1ce   :  { %v624_v22 = vmul.f32 %v802_v19, %v1168_v31 }
 0x1cf   :  { %803 = vtanh.f32 %v513_v21  ;;  %689 = vst [vmem:[%s1438_s2 + $0x88] sm:$0xff] %v513_v21  ;;  %559 = vmatmul.f32.vlgmr.msra.gmra.mxu3 %v462_v20 }
 0x1d0   :  { %656 = vst [vmem:[%s1438_s2 + $0x70] sm:$0xff] %v624_v22 }
 0x1d2   :  { %v417_v23 = vpop.f32.mrf.mxu3 }
 0x1d3   :  { %v418_v24 = vadd.f32 %v1120_v52, %v417_v23 }
 0x1d4   :  { %v515_v25 = vpop.f32.mrf.mxu2 }
 0x1d5   :  { %v804_v27 = vpop.eup %803  ;;  %v463_v34 = vmax.f32 %v418_v24, 0.0  ;;  %v516_v28 = vadd.f32 %v1158_v26, %v515_v25 }
 0x1d6   :  { %v625_v29 = vmul.f32 %v804_v27, %v1168_v31 }
 0x1d7   :  { %805 = vtanh.f32 %v516_v28  ;;  %690 = vst [vmem:[%s1438_s2 + $0x98] sm:$0xff] %v516_v28  ;;  %562 = vmatmul.f32.gmra.mxu3 %v463_v34 }
 0x1d8   :  { %657 = vst [vmem:[%s1438_s2 + $0x80] sm:$0xff] %v625_v29 }
 0x1da   :  { %v420_v30 = vpop.f32.mrf.mxu3 }
 0x1db   :  { %v421_v32 = vadd.f32 %v1120_v52, %v420_v30 }
 0x1dc   :  { %v518_v33 = vpop.f32.mrf.mxu2 }
 0x1dd   :  { %v806_v35 = vpop.eup %805  ;;  %v464_v36 = vmax.f32 %v421_v32, 0.0  ;;  %v519_v37 = vadd.f32 %v1158_v26, %v518_v33 }
 0x1de   :  { %v626_v38 = vmul.f32 %v806_v35, %v1168_v31 }
 0x1df   :  { %807 = vtanh.f32 %v519_v37  ;;  %691 = vst [vmem:[%s1438_s2 + $0xa8] sm:$0xff] %v519_v37  ;;  %565 = vmatmul.f32.gmra.mxu3 %v464_v36 }
 0x1e0   :  { %658 = vst [vmem:[%s1438_s2 + $0x90] sm:$0xff] %v626_v38 }
 0x1e2   :  { %v423_v39 = vpop.f32.mrf.mxu3 }
 0x1e3   :  { %v424_v40 = vadd.f32 %v1120_v52, %v423_v39 }
 0x1e4   :  { %v521_v41 = vpop.f32.mrf.mxu2 }
 0x1e5   :  { %v808_v42 = vpop.eup %807  ;;  %v465_v43 = vmax.f32 %v424_v40, 0.0  ;;  %v522_v44 = vadd.f32 %v1158_v26, %v521_v41 }
 0x1e6   :  { %v627_v45 = vmul.f32 %v808_v42, %v1168_v31 }
 0x1e7   :  { %809 = vtanh.f32 %v522_v44  ;;  %692 = vst [vmem:[%s1438_s2 + $0xb8] sm:$0xff] %v522_v44  ;;  %568 = vmatmul.f32.gmra.mxu3 %v465_v43 }
 0x1e8   :  { %659 = vst [vmem:[%s1438_s2 + $0xa0] sm:$0xff] %v627_v45 }
 0x1ea   :  { %v426_v46 = vpop.f32.mrf.mxu3 }
 0x1eb   :  { %v427_v47 = vadd.f32 %v1120_v52, %v426_v46 }
 0x1ec   :  { %v524_v48 = vpop.f32.mrf.mxu2 }
 0x1ed   :  { %v810_v49 = vpop.eup %809  ;;  %v466_v50 = vmax.f32 %v427_v47, 0.0  ;;  %v525_v51 = vadd.f32 %v1158_v26, %v524_v48 }
 0x1ee   :  { %v628_v53 = vmul.f32 %v810_v49, %v1168_v31 }
 0x1ef   :  { %811 = vtanh.f32 %v525_v51  ;;  %693 = vst [vmem:[%s1438_s2 + $0xc8] sm:$0xff] %v525_v51  ;;  %571 = vmatmul.f32.gmra.mxu3 %v466_v50 }
 0x1f0   :  { %660 = vst [vmem:[%s1438_s2 + $0xb0] sm:$0xff] %v628_v53 }
 0x1f2   :  { %v429_v54 = vpop.f32.mrf.mxu3 }
 0x1f3   :  { %v430_v55 = vadd.f32 %v1120_v52, %v429_v54 }
 0x1f4   :  { %v527_v56 = vpop.f32.mrf.mxu2 }
 0x1f5   :  { %v812_v57 = vpop.eup %811  ;;  %v467_v58 = vmax.f32 %v430_v55, 0.0  ;;  %v528_v59 = vadd.f32 %v1158_v26, %v527_v56 }
 0x1f6   :  { %v629_v60 = vmul.f32 %v812_v57, %v1168_v31 }
 0x1f7   :  { %813 = vtanh.f32 %v528_v59  ;;  %694 = vst [vmem:[%s1438_s2 + $0xd8] sm:$0xff] %v528_v59  ;;  %574 = vmatmul.f32.gmra.mxu3 %v467_v58 }
 0x1f8   :  { %661 = vst [vmem:[%s1438_s2 + $0xc0] sm:$0xff] %v629_v60 }
 0x1fa   :  { %v432_v61 = vpop.f32.mrf.mxu3 }
 0x1fb   :  { %v433_v62 = vadd.f32 %v1120_v52, %v432_v61 }
 0x1fc   :  { %v530_v63 = vpop.f32.mrf.mxu2 }
 0x1fd   :  { %v814_v0 = vpop.eup %813  ;;  %v468_v1 = vmax.f32 %v433_v62, 0.0  ;;  %v531_v2 = vadd.f32 %v1158_v26, %v530_v63 }
 0x1fe   :  { %v630_v3 = vmul.f32 %v814_v0, %v1168_v31 }
 0x1ff   :  { %815 = vtanh.f32 %v531_v2  ;;  %695 = vst [vmem:[%s1438_s2 + $0xe8] sm:$0xff] %v531_v2  ;;  %577 = vmatmul.f32.gmra.mxu3 %v468_v1 }
 0x200   :  { %662 = vst [vmem:[%s1438_s2 + $0xd0] sm:$0xff] %v630_v3 }
 0x202   :  { %v435_v4 = vpop.f32.mrf.mxu3 }
 0x203   :  { %v436_v5 = vadd.f32 %v1120_v52, %v435_v4 }
 0x204   :  { %v533_v6 = vpop.f32.mrf.mxu2 }
 0x205   :  { %v816_v7 = vpop.eup %815  ;;  %v469_v8 = vmax.f32 %v436_v5, 0.0  ;;  %v534_v9 = vadd.f32 %v1158_v26, %v533_v6 }
 0x206   :  { %v631_v10 = vmul.f32 %v816_v7, %v1168_v31 }
 0x207   :  { %817 = vtanh.f32 %v534_v9  ;;  %696 = vst [vmem:[%s1438_s2 + $0xf8] sm:$0xff] %v534_v9  ;;  %580 = vmatmul.f32.gmra.mxu3 %v469_v8 }
 0x208   :  { %663 = vst [vmem:[%s1438_s2 + $0xe0] sm:$0xff] %v631_v10 }
 0x20c   :  { %v536_v11 = vpop.f32.mrf.mxu2 }
 0x20d   :  { %v818_v12 = vpop.eup %817  ;;  %v537_v52 = vadd.f32 %v1158_v26, %v536_v11 }
 0x20e   :  { %v632_v13 = vmul.f32 %v818_v12, %v1168_v31 }
 0x20f   :  { %819 = vtanh.f32 %v537_v52  ;;  %697 = vst [vmem:[%s1438_s2 + $0x108] sm:$0xff] %v537_v52 }
 0x210   :  { %664 = vst [vmem:[%s1438_s2 + $0xf0] sm:$0xff] %v632_v13 }
 0x214   :  { %v539_v14 = vpop.f32.mrf.mxu2 }
 0x215   :  { %v820_v15 = vpop.eup %819  ;;  %v540_v16 = vadd.f32 %v1158_v26, %v539_v14 }
 0x216   :  { %v633_v17 = vmul.f32 %v820_v15, %v1168_v31 }
 0x217   :  { %821 = vtanh.f32 %v540_v16  ;;  %698 = vst [vmem:[%s1438_s2 + $0x118] sm:$0xff] %v540_v16 }
 0x218   :  { %665 = vst [vmem:[%s1438_s2 + $0x100] sm:$0xff] %v633_v17 }
 0x21c   :  { %v542_v18 = vpop.f32.mrf.mxu2 }
 0x21d   :  { %v822_v19 = vpop.eup %821  ;;  %v543_v20 = vadd.f32 %v1158_v26, %v542_v18 }
 0x21e   :  { %v634_v21 = vmul.f32 %v822_v19, %v1168_v31 }
 0x21f   :  { %823 = vtanh.f32 %v543_v20  ;;  %699 = vst [vmem:[%s1438_s2 + $0x128] sm:$0xff] %v543_v20 }
 0x220   :  { %666 = vst [vmem:[%s1438_s2 + $0x110] sm:$0xff] %v634_v21 }
 0x224   :  { %v545_v22 = vpop.f32.mrf.mxu2 }
 0x225   :  { %v824_v23 = vpop.eup %823  ;;  %v546_v24 = vadd.f32 %v1158_v26, %v545_v22 }
 0x226   :  { %v635_v25 = vmul.f32 %v824_v23, %v1168_v31 }
 0x227   :  { %825 = vtanh.f32 %v546_v24  ;;  %700 = vst [vmem:[%s1438_s2 + $0x138] sm:$0xff] %v546_v24 }
 0x228   :  { %667 = vst [vmem:[%s1438_s2 + $0x120] sm:$0xff] %v635_v25 }
 0x22c   :  { %v548_v27 = vpop.f32.mrf.mxu2 }
 0x22d   :  { %v826_v34 = vpop.eup %825  ;;  %v549_v28 = vadd.f32 %v1158_v26, %v548_v27 }
 0x22e   :  { %v636_v29 = vmul.f32 %v826_v34, %v1168_v31 }
 0x22f   :  { %827 = vtanh.f32 %v549_v28  ;;  %701 = vst [vmem:[%s1438_s2 + $0x148] sm:$0xff] %v549_v28 }
 0x230   :  { %668 = vst [vmem:[%s1438_s2 + $0x130] sm:$0xff] %v636_v29 }
 0x234   :  { %v551_v30 = vpop.f32.mrf.mxu2 }
 0x235   :  { %v828_v32 = vpop.eup %827  ;;  %v552_v33 = vadd.f32 %v1158_v26, %v551_v30 }
 0x236   :  { %v637_v35 = vmul.f32 %v828_v32, %v1168_v31 }
 0x237   :  { %829 = vtanh.f32 %v552_v33  ;;  %702 = vst [vmem:[%s1438_s2 + $0x158] sm:$0xff] %v552_v33 }
 0x238   :  { %669 = vst [vmem:[%s1438_s2 + $0x140] sm:$0xff] %v637_v35 }
 0x23c   :  { %v554_v36 = vpop.f32.mrf.mxu2 }
 0x23d   :  { %v830_v37 = vpop.eup %829  ;;  %v555_v38 = vadd.f32 %v1158_v26, %v554_v36 }
 0x23e   :  { %v638_v39 = vmul.f32 %v830_v37, %v1168_v31 }
 0x23f   :  { %831 = vtanh.f32 %v555_v38  ;;  %703 = vst [vmem:[%s1438_s2 + $0x168] sm:$0xff] %v555_v38 }
 0x240   :  { %670 = vst [vmem:[%s1438_s2 + $0x150] sm:$0xff] %v638_v39 }
 0x244   :  { %v557_v40 = vpop.f32.mrf.mxu2 }
 0x245   :  { %v832_v41 = vpop.eup %831  ;;  %v558_v42 = vadd.f32 %v1158_v26, %v557_v40 }
 0x246   :  { %v639_v43 = vmul.f32 %v832_v41, %v1168_v31 }
 0x247   :  { %833 = vtanh.f32 %v558_v42  ;;  %704 = vst [vmem:[%s1438_s2 + $0x178] sm:$0xff] %v558_v42 }
 0x248   :  { %671 = vst [vmem:[%s1438_s2 + $0x160] sm:$0xff] %v639_v43 }
 0x24d   :  { %v834_v44 = vpop.eup %833 }
 0x24e   :  { %v640_v45 = vmul.f32 %v834_v44, %v1168_v31 }
 0x250   :  { %672 = vst [vmem:[%s1438_s2 + $0x170] sm:$0xff] %v640_v45 }
 0x252   :  { %v560_v46 = vpop.f32.mrf.mxu3 }
 0x253   :  { %v561_v47 = vadd.f32 %v1158_v26, %v560_v46 }
 0x255   :  { %835 = vtanh.f32 %v561_v47  ;;  %705 = vst [vmem:[%s1438_s2 + $0x188] sm:$0xff] %v561_v47 }
 0x25a   :  { %v563_v48 = vpop.f32.mrf.mxu3 }
 0x25b   :  { %v836_v49 = vpop.eup %835  ;;  %v564_v50 = vadd.f32 %v1158_v26, %v563_v48 }
 0x25c   :  { %v641_v51 = vmul.f32 %v836_v49, %v1168_v31 }
 0x25d   :  { %837 = vtanh.f32 %v564_v50  ;;  %706 = vst [vmem:[%s1438_s2 + $0x198] sm:$0xff] %v564_v50 }
 0x25e   :  { %673 = vst [vmem:[%s1438_s2 + $0x180] sm:$0xff] %v641_v51 }
 0x262   :  { %v566_v53 = vpop.f32.mrf.mxu3 }
 0x263   :  { %v838_v54 = vpop.eup %837  ;;  %v567_v55 = vadd.f32 %v1158_v26, %v566_v53 }
 0x264   :  { %v642_v56 = vmul.f32 %v838_v54, %v1168_v31 }
 0x265   :  { %839 = vtanh.f32 %v567_v55  ;;  %707 = vst [vmem:[%s1438_s2 + $0x1a8] sm:$0xff] %v567_v55 }
 0x266   :  { %674 = vst [vmem:[%s1438_s2 + $0x190] sm:$0xff] %v642_v56 }
 0x26a   :  { %v569_v57 = vpop.f32.mrf.mxu3 }
 0x26b   :  { %v840_v58 = vpop.eup %839  ;;  %v570_v59 = vadd.f32 %v1158_v26, %v569_v57 }
 0x26c   :  { %v643_v60 = vmul.f32 %v840_v58, %v1168_v31 }
 0x26d   :  { %841 = vtanh.f32 %v570_v59  ;;  %708 = vst [vmem:[%s1438_s2 + $0x1b8] sm:$0xff] %v570_v59 }
 0x26e   :  { %675 = vst [vmem:[%s1438_s2 + $0x1a0] sm:$0xff] %v643_v60 }
 0x272   :  { %v572_v61 = vpop.f32.mrf.mxu3 }
 0x273   :  { %v842_v62 = vpop.eup %841  ;;  %v573_v63 = vadd.f32 %v1158_v26, %v572_v61 }
 0x274   :  { %v644_v0 = vmul.f32 %v842_v62, %v1168_v31 }
 0x275   :  { %843 = vtanh.f32 %v573_v63  ;;  %709 = vst [vmem:[%s1438_s2 + $0x1c8] sm:$0xff] %v573_v63 }
 0x276   :  { %676 = vst [vmem:[%s1438_s2 + $0x1b0] sm:$0xff] %v644_v0 }
 0x27a   :  { %v575_v1 = vpop.f32.mrf.mxu3 }
 0x27b   :  { %v844_v2 = vpop.eup %843  ;;  %v576_v3 = vadd.f32 %v1158_v26, %v575_v1 }
 0x27c   :  { %v645_v4 = vmul.f32 %v844_v2, %v1168_v31 }
 0x27d   :  { %845 = vtanh.f32 %v576_v3  ;;  %710 = vst [vmem:[%s1438_s2 + $0x1d8] sm:$0xff] %v576_v3 }
 0x27e   :  { %677 = vst [vmem:[%s1438_s2 + $0x1c0] sm:$0xff] %v645_v4 }
 0x282   :  { %v578_v5 = vpop.f32.mrf.mxu3 }
 0x283   :  { %v846_v6 = vpop.eup %845  ;;  %v579_v7 = vadd.f32 %v1158_v26, %v578_v5 }
 0x284   :  { %v646_v8 = vmul.f32 %v846_v6, %v1168_v31 }
 0x285   :  { %847 = vtanh.f32 %v579_v7  ;;  %711 = vst [vmem:[%s1438_s2 + $0x1e8] sm:$0xff] %v579_v7 }
 0x286   :  { %678 = vst [vmem:[%s1438_s2 + $0x1d0] sm:$0xff] %v646_v8 }
 0x28a   :  { %v581_v9 = vpop.f32.mrf.mxu3 }
 0x28b   :  { %v848_v10 = vpop.eup %847  ;;  %v582_v11 = vadd.f32 %v1158_v26, %v581_v9 }
 0x28c   :  { %v647_v12 = vmul.f32 %v848_v10, %v1168_v31 }
 0x28d   :  { %849 = vtanh.f32 %v582_v11  ;;  %712 = vst [vmem:[%s1438_s2 + $0x1f8] sm:$0xff] %v582_v11 }
 0x28e   :  { %679 = vst [vmem:[%s1438_s2 + $0x1e0] sm:$0xff] %v647_v12 }
 0x293   :  { %v850_v52 = vpop.eup %849 }
 0x294   :  { %v648_v13 = vmul.f32 %v850_v52, %v1168_v31 }
 0x296   :  { %680 = vst [vmem:[%s1438_s2 + $0x1f0] sm:$0xff] %v648_v13 }

</bundles_post_ra>
